<compile_context>
chip_gen: v6e
topology: v6e:2x2x1
jax: 0.10.0
libtpu: 0.0.40
codegen_flags: <defaults>
</compile_context>

<pallas_src>
import functools

import numpy as np
import jax
import jax.numpy as jnp
from jax import lax
from jax.experimental import pallas as pl
from jax.experimental.pallas import tpu as pltpu


def _round_up(x, m):
    return (x + m - 1) // m * m


# ----------------------------------------------------------------------------
# Fused kernel: conv1 + residual trunk + policy/value heads.
# Grid axis = residual-block index (sequential; activation carried in VMEM).
# ----------------------------------------------------------------------------
def fused_forward_kernel(
        # inputs
        x0_ref, mask_ref, c1w_ref, c1b_ref,
        wa_ref, sa_ref, ba_ref, wb_ref, sb_ref, bb_ref,
        wp_ref, ps_ref, pb_ref, wfc0_ref, wfc1_ref, bfc_ref,
        wv_ref, vs_ref, vb_ref, vw1_ref, vb1_ref, vw2_ref, vb2_ref,
        # outputs
        pol_ref, val_ref,
        # scratch
        act_ref, col_ref,
        *, shifts, n_filters, cin_pad, n_batch, p_pad, a_pad, n_actions):
    C = n_filters
    b = pl.program_id(0)

    def conv3x3(x_f32, w_bf16, cin):
        """3x3 same conv: roll+mask im2col into col_ref, one big-K matmul."""
        for k, sh in enumerate(shifts):
            rolled = x_f32 if sh == 0 else pltpu.roll(x_f32, sh, 1)
            tap = rolled * mask_ref[k][:cin, :]
            col_ref[k * cin:(k + 1) * cin, :] = tap.astype(jnp.bfloat16)
        return jnp.dot(w_bf16, col_ref[0:9 * cin, :],
                       preferred_element_type=jnp.float32)

    # ---- conv1 + bias + ReLU (the reference model has no BN here) ----------
    @pl.when(b == 0)
    def _():
        y = conv3x3(x0_ref[...], c1w_ref[...], cin_pad)
        act_ref[...] = jnp.maximum(y + c1b_ref[...], 0.0)

    # ---- residual block b: conv+BN+ReLU, conv+BN, +residual, ReLU ----------
    x = act_ref[...]
    ya = jnp.maximum(conv3x3(x, wa_ref[0], C) * sa_ref[0] + ba_ref[0], 0.0)
    yb = conv3x3(ya, wb_ref[0], C) * sb_ref[0] + bb_ref[0]
    act_ref[...] = jnp.maximum(yb + x, 0.0)

    # ---- heads at the last grid step ----------------------------------------
    @pl.when(b == pl.num_programs(0) - 1)
    def _():
        feat = act_ref[...]                                       # (C, N*Ppad)
        # 1x1 convs (+folded BN, ReLU) for the whole folded batch at once.
        h_all = jnp.maximum(
            jnp.dot(wp_ref[...], feat, preferred_element_type=jnp.float32)
            * ps_ref[...] + pb_ref[...], 0.0)                     # (2, N*Ppad)
        hv_all = jnp.maximum(
            jnp.dot(wv_ref[...], feat, preferred_element_type=jnp.float32)
            * vs_ref[...] + vb_ref[...], 0.0)                     # (1, N*Ppad)
        valid_a = (jax.lax.broadcasted_iota(jnp.int32, (1, a_pad), 1)
                   < n_actions)
        for n in range(n_batch):
            lo = n * p_pad
            h = h_all[:, lo:lo + p_pad]                           # (2, Ppad)
            hv = hv_all[:, lo:lo + p_pad]                         # (1, Ppad)
            # policy: Linear(2P -> A) + masked softmax over the A valid lanes.
            logits = (jnp.dot(h[0:1, :], wfc0_ref[...],
                              preferred_element_type=jnp.float32)
                      + jnp.dot(h[1:2, :], wfc1_ref[...],
                                preferred_element_type=jnp.float32)
                      + bfc_ref[...])                             # (1, a_pad)
            logits = jnp.where(valid_a, logits, -jnp.inf)
            m = jnp.max(logits, axis=-1, keepdims=True)
            e = jnp.where(valid_a, jnp.exp(logits - m), 0.0)
            inv = pl.reciprocal(jnp.sum(e, axis=-1, keepdims=True),
                                approx=True)
            pol_ref[n:n + 1, :] = e * inv
            # value: Linear(P -> 256) + ReLU + Linear(256 -> 1) + tanh.
            v1 = jnp.maximum(
                jnp.dot(hv, vw1_ref[...], preferred_element_type=jnp.float32)
                + vb1_ref[...], 0.0)                              # (1, 256)
            v2 = (jnp.sum(v1 * vw2_ref[...], axis=-1, keepdims=True)
                  + vb2_ref[...])                                 # (1, 1)
            val_ref[n:n + 1, :] = jnp.broadcast_to(
                jnp.tanh(v2), (1, val_ref.shape[1]))


# ----------------------------------------------------------------------------
# Wrapper
# ----------------------------------------------------------------------------
def _const_spec(shape):
    nd = len(shape)
    return pl.BlockSpec(shape, lambda b, _nd=nd: (0,) * _nd)


def _per_block_spec(shape):
    nd = len(shape)
    return pl.BlockSpec((1,) + tuple(shape[1:]),
                        lambda b, _nd=nd: (b,) + (0,) * (_nd - 1))


def forward(x_nchw, params, mask, *, shifts):
    n_batch, cin, H, W = x_nchw.shape
    P = H * W
    A = P + 1
    p_pad = _round_up(P, 128)
    a_pad = _round_up(A, 128)
    NP = n_batch * p_pad
    C = params["c1b"].shape[0]
    cin_pad = params["c1w"].shape[1] // 9
    nb = params["wa"].shape[0]

    # Pack input NCHW -> (Cin_pad, N*P_pad): batch folded into the lane axis.
    x = x_nchw.astype(jnp.float32).reshape(n_batch, cin, P)
    x = jnp.transpose(x, (1, 0, 2))
    x = jnp.pad(x, ((0, cin_pad - cin), (0, 0), (0, p_pad - P)))
    x0 = x.reshape(cin_pad, NP)

    kernel = functools.partial(
        fused_forward_kernel, shifts=tuple(shifts), n_filters=C,
        cin_pad=cin_pad, n_batch=n_batch, p_pad=p_pad, a_pad=a_pad,
        n_actions=A)

    pol_pad, val_pad = pl.pallas_call(
        kernel,
        out_shape=(jax.ShapeDtypeStruct((n_batch, a_pad), jnp.float32),
                   jax.ShapeDtypeStruct((n_batch, 128), jnp.float32)),
        grid=(nb,),
        in_specs=[
            _const_spec((cin_pad, NP)),            # x0
            _const_spec((9, C, NP)),               # boundary masks
            _const_spec((C, 9 * cin_pad)),         # conv1 fused weight (bf16)
            _const_spec((C, 1)),                   # conv1 bias
            _per_block_spec((nb, C, 9 * C)),       # wa (bf16)
            _per_block_spec((nb, C, 1)),           # sa
            _per_block_spec((nb, C, 1)),           # ba
            _per_block_spec((nb, C, 9 * C)),       # wb (bf16)
            _per_block_spec((nb, C, 1)),           # sb
            _per_block_spec((nb, C, 1)),           # bb
            _const_spec((2, C)),                   # wp
            _const_spec((2, 1)),                   # ps
            _const_spec((2, 1)),                   # pb
            _const_spec((p_pad, a_pad)),           # wfc0
            _const_spec((p_pad, a_pad)),           # wfc1
            _const_spec((1, a_pad)),               # bfc
            _const_spec((1, C)),                   # wv
            _const_spec((1, 1)),                   # vs
            _const_spec((1, 1)),                   # vb
            _const_spec((p_pad, 256)),             # vw1
            _const_spec((1, 256)),                 # vb1
            _const_spec((1, 256)),                 # vw2
            _const_spec((1, 1)),                   # vb2
        ],
        out_specs=(_const_spec((n_batch, a_pad)),
                   _const_spec((n_batch, 128))),
        scratch_shapes=[pltpu.VMEM((C, NP), jnp.float32),        # activation
                        pltpu.VMEM((9 * C, NP), jnp.bfloat16)],  # im2col
        compiler_params=pltpu.CompilerParams(
            dimension_semantics=("arbitrary",),
            vmem_limit_bytes=32 * 1024 * 1024),
    )(x0, mask, params["c1w"], params["c1b"],
      params["wa"], params["sa"], params["ba"],
      params["wb"], params["sb"], params["bb"],
      params["wp"], params["ps"], params["pb"],
      params["wfc0"], params["wfc1"], params["bfc"],
      params["wv"], params["vs"], params["vb"],
      params["vw1"], params["vb1"], params["vw2"], params["vb2"])

    return pol_pad[:, :A], val_pad[:, :1]


# ----------------------------------------------------------------------------
# Constants: per-tap lane shifts (for pltpu.roll) and 0/1 boundary masks.
# ----------------------------------------------------------------------------
def detect_roll_like_jnp():
    """Probe pltpu.roll direction: True if it matches jnp.roll semantics."""
    def k(x_ref, o_ref):
        o_ref[...] = pltpu.roll(x_ref[...], 3, 1)

    x = jax.lax.broadcasted_iota(jnp.float32, (8, 128), 1)
    y = pl.pallas_call(
        k, out_shape=jax.ShapeDtypeStruct((8, 128), jnp.float32))(x)
    if bool(jnp.array_equal(y, jnp.roll(x, 3, axis=1))):
        return True
    if bool(jnp.array_equal(y, jnp.roll(x, -3, axis=1))):
        return False
    raise RuntimeError("unexpected pltpu.roll semantics")


def build_conv_constants(H, W, n_batch, p_pad, n_chan, roll_like_jnp):
    P = H * W
    NP = n_batch * p_pad
    shifts = []
    mask = np.zeros((9, NP), np.float32)
    for dy in range(3):
        for dx in range(3):
            k = dy * 3 + dx
            off = (dy - 1) * W + (dx - 1)         # flat source = dest + off
            shift = (-off) % NP if roll_like_jnp else off % NP
            shifts.append(int(shift))
            for n in range(n_batch):
                for i in range(H):
                    for j in range(W):
                        if 0 <= i + dy - 1 < H and 0 <= j + dx - 1 < W:
                            mask[k, n * p_pad + i * W + j] = 1.0
    mask = np.broadcast_to(mask[:, None, :], (9, n_chan, NP))
    return tuple(shifts), jnp.asarray(np.ascontiguousarray(mask))


# ----------------------------------------------------------------------------
# Parameter construction (synthetic, deterministic) and packing.
# ----------------------------------------------------------------------------
def init_base_params(key, board_size=9, in_channels=17):
    """PyTorch-layout params; conv weights stored in bf16 so the kernel and
    the pure-JAX reference use bit-identical operands."""
    if board_size <= 9:
        C, nb = 64, 30
    elif board_size <= 13:
        C, nb = 128, 40
    else:
        C, nb = 256, 50
    P = board_size * board_size
    A = P + 1
    eps = 1e-5
    kit = iter(jax.random.split(key, 64))

    def nrm(shape, std):
        return jax.random.normal(next(kit), shape, jnp.float32) * std

    def fold_bn(conv_b, gamma, beta, mean, var):
        scale = gamma / jnp.sqrt(var + eps)
        return scale, beta + scale * (conv_b - mean)

    base = {}
    base["conv1_w"] = nrm((C, in_channels, 3, 3), 0.05).astype(jnp.bfloat16)
    base["conv1_b"] = nrm((C,), 0.02)

    def res_params():
        w = nrm((nb, C, C, 3, 3), 0.01).astype(jnp.bfloat16)
        s, b = fold_bn(nrm((nb, C), 0.02), 1.0 + nrm((nb, C), 0.05),
                       nrm((nb, C), 0.05), nrm((nb, C), 0.05),
                       1.0 + jnp.abs(nrm((nb, C), 0.05)))
        return w, s, b

    base["wa"], base["sa"], base["ba"] = res_params()
    base["wb"], base["sb"], base["bb"] = res_params()

    base["wp"] = nrm((2, C), 0.05)
    base["ps"], base["pb"] = fold_bn(nrm((2,), 0.02), 1.0 + nrm((2,), 0.05),
                                     nrm((2,), 0.05), nrm((2,), 0.05),
                                     1.0 + jnp.abs(nrm((2,), 0.05)))
    base["wfc"] = nrm((A, 2 * P), 0.05)
    base["bfc"] = nrm((A,), 0.02)

    base["wv"] = nrm((1, C), 0.05)
    base["vs"], base["vb"] = fold_bn(nrm((1,), 0.02), 1.0 + nrm((1,), 0.05),
                                     nrm((1,), 0.05), nrm((1,), 0.05),
                                     1.0 + jnp.abs(nrm((1,), 0.05)))
    base["vw1"] = nrm((256, P), 0.05)
    base["vb1"] = nrm((256,), 0.02)
    base["vw2"] = nrm((1, 256), 0.05)
    base["vb2"] = nrm((1,), 0.02)
    return base


def pack_params(base, board_size):
    """Fuse / pad / cast params into the kernel layout."""
    C = base["conv1_b"].shape[0]
    nb = base["wa"].shape[0]
    cin = base["conv1_w"].shape[1]
    cin_pad = _round_up(cin, 16)
    P = board_size * board_size
    A = P + 1
    p_pad = _round_up(P, 128)
    a_pad = _round_up(A, 128)

    kp = {}
    w1 = jnp.transpose(base["conv1_w"].reshape(C, cin, 9), (0, 2, 1))
    w1 = jnp.pad(w1, ((0, 0), (0, 0), (0, cin_pad - cin)))
    kp["c1w"] = w1.reshape(C, 9 * cin_pad).astype(jnp.bfloat16)
    kp["c1b"] = base["conv1_b"].reshape(C, 1)

    def fuse(w):  # (nb, C, C, 3, 3) -> (nb, C, 9*C), k-major / cin-minor
        w = jnp.transpose(w.reshape(nb, C, C, 9), (0, 1, 3, 2))
        return w.reshape(nb, C, 9 * C).astype(jnp.bfloat16)

    kp["wa"], kp["wb"] = fuse(base["wa"]), fuse(base["wb"])
    kp["sa"] = base["sa"].reshape(nb, C, 1)
    kp["ba"] = base["ba"].reshape(nb, C, 1)
    kp["sb"] = base["sb"].reshape(nb, C, 1)
    kp["bb"] = base["bb"].reshape(nb, C, 1)

    kp["wp"] = base["wp"]
    kp["ps"] = base["ps"].reshape(2, 1)
    kp["pb"] = base["pb"].reshape(2, 1)
    wt = base["wfc"].T                                     # (2P, A)
    kp["wfc0"] = jnp.pad(wt[:P], ((0, p_pad - P), (0, a_pad - A)))
    kp["wfc1"] = jnp.pad(wt[P:], ((0, p_pad - P), (0, a_pad - A)))
    kp["bfc"] = jnp.pad(base["bfc"].reshape(1, A), ((0, 0), (0, a_pad - A)))

    kp["wv"] = base["wv"]
    kp["vs"] = base["vs"].reshape(1, 1)
    kp["vb"] = base["vb"].reshape(1, 1)
    kp["vw1"] = jnp.pad(base["vw1"].T, ((0, p_pad - P), (0, 0)))
    kp["vb1"] = base["vb1"].reshape(1, 256)
    kp["vw2"] = base["vw2"]
    kp["vb2"] = base["vb2"].reshape(1, 1)
    return kp


# ----------------------------------------------------------------------------
# Pure-JAX reference (same bf16 conv weights, f32 accumulation).
# ----------------------------------------------------------------------------
def reference_forward(x, base):
    n = x.shape[0]
    hi = lax.Precision.HIGHEST

    def conv3(h, w):
        return lax.conv_general_dilated(
            h.astype(jnp.bfloat16), w, (1, 1), "SAME",
            dimension_numbers=("NCHW", "OIHW", "NCHW"),
            preferred_element_type=jnp.float32)

    def cb(v):
        return v[None, :, None, None]

    h = jax.nn.relu(conv3(x, base["conv1_w"]) + cb(base["conv1_b"]))
    nb = base["wa"].shape[0]
    for i in range(nb):
        r = h
        ya = jax.nn.relu(conv3(h, base["wa"][i]) * cb(base["sa"][i])
                         + cb(base["ba"][i]))
        yb = conv3(ya, base["wb"][i]) * cb(base["sb"][i]) + cb(base["bb"][i])
        h = jax.nn.relu(yb + r)

    hp = jax.nn.relu(
        jnp.einsum("oc,nchw->nohw", base["wp"], h, precision=hi)
        * cb(base["ps"]) + cb(base["pb"]))
    logits = (jnp.dot(hp.reshape(n, -1), base["wfc"].T, precision=hi)
              + base["bfc"][None, :])
    policy = jax.nn.softmax(logits, axis=-1)

    hv = jax.nn.relu(
        jnp.einsum("oc,nchw->nohw", base["wv"], h, precision=hi)
        * cb(base["vs"]) + cb(base["vb"]))
    v1 = jax.nn.relu(jnp.dot(hv.reshape(n, -1), base["vw1"].T, precision=hi)
                     + base["vb1"][None, :])
    v2 = jnp.dot(v1, base["vw2"].T, precision=hi) + base["vb2"][None, :]
    return policy, jnp.tanh(v2)


# ----------------------------------------------------------------------------
if __name__ == "__main__":
    board_size = 9            # <= 9  =>  64 filters, 30 residual blocks
    batch = 2
    in_channels = 17

    key = jax.random.PRNGKey(0)
    k_in, k_par = jax.random.split(key)
    base = init_base_params(k_par, board_size=board_size,
                            in_channels=in_channels)
    x = jax.random.normal(k_in, (batch, in_channels, board_size, board_size),
                          jnp.float32)

    C = base["conv1_b"].shape[0]
    p_pad = _round_up(board_size * board_size, 128)
    roll_like_jnp = detect_roll_like_jnp()
    shifts, mask = build_conv_constants(board_size, board_size, batch, p_pad,
                                        C, roll_like_jnp)
    kparams = pack_params(base, board_size)

    fwd = jax.jit(functools.partial(forward, shifts=shifts))
    policy, value = fwd(x, kparams, mask)
    policy = jax.block_until_ready(policy)
    value = jax.block_until_ready(value)

    A = board_size * board_size + 1
    assert policy.shape == (batch, A)
    assert value.shape == (batch, 1)
    assert bool(jnp.all(jnp.isfinite(policy)))
    assert bool(jnp.all(jnp.isfinite(value)))
    assert bool(jnp.all(jnp.abs(jnp.sum(policy, axis=1) - 1.0) < 5e-3))
    assert bool(jnp.all(jnp.abs(value) <= 1.0 + 1e-5))

    # Numerical check against the pure-JAX reference (validates roll direction,
    # boundary masks, im2col weight layout, BN folding and both heads).
    pol_ref, val_ref = reference_forward(x, base)
    perr = float(jnp.max(jnp.abs(policy - pol_ref)))
    verr = float(jnp.max(jnp.abs(value - val_ref)))
    assert perr < 5e-3, f"policy mismatch: {perr}"
    assert verr < 5e-3, f"value mismatch: {verr}"

    print("KERNEL_OK")
</pallas_src>

<mosaic_0001>
module attributes {stable_mosaic.version = 11 : i64} {
  func.func @k(%arg0: memref<8x128xf32, #tpu.memory_space<vmem>>, %arg1: memref<8x128xf32, #tpu.memory_space<vmem>>) attributes {dimension_semantics = [], scalar_prefetch = 0 : i64, scratch_operands = 0 : i64, tpu.core_type = #tpu.core_type<tc>} {
    %c0 = arith.constant 0 : index
    %c0_0 = arith.constant 0 : index
    %0 = vector.load %arg0[%c0, %c0_0] : memref<8x128xf32, #tpu.memory_space<vmem>>, vector<8x128xf32>
    %c3_i32 = arith.constant 3 : i32
    %1 = tpu.dynamic_rotate %0 by %c3_i32 dim 1 : vector<8x128xf32>, i32 -> vector<8x128xf32>
    %c0_1 = arith.constant 0 : index
    %c0_2 = arith.constant 0 : index
    %2 = vector.load %arg1[%c0_1, %c0_2] : memref<8x128xf32, #tpu.memory_space<vmem>>, vector<8x128xf32>
    tpu.vector_store %arg1[%c0_1, %c0_2], %1 {strides = array<i32>} : memref<8x128xf32, #tpu.memory_space<vmem>>, vector<8x128xf32>,
    return
  }
}

</mosaic_0001>

<bundles_post_ra>
// kernel: tpu_custom_call.1
= control target key start
LH: loop header
LB: loop body
LE: loop exit
PB: predicated region body
PF: predicated region fallthrough
CT: control target
= control target key end

     0   :  { %6 = vsyncpa [#allocation3], 0  ;;  %s106_s0 = inlined_call_operand.hbm [shape: f32[8,128], index: 0, kind: input, shape index: {}]   ;;  %s107_s1 = inlined_call_operand.hbm [shape: f32[8,128], index: 1, kind: output, shape index: {}]  }
   0x1   :  { %7 = vsyncpa [#allocation4], 0  ;;  %s87_s6 = smov [#allocation2]  }
   0x2   :  { %s14_s7 = sshll.u32 %s87_s6, 4  ;;  %s15_s7 = int_to_ptr.vmem [resolvable:$true] %s14_s7 }
   0x3   :  { %s51_s8 = scalar_lea.vmem %s15_s7, 128  ;;  %p56_p1 = scmp.lt.s32.totalorder %s15_s7, %s15_s7 }
   0x4   :  { %p52_p0 = scmp.ne.s32.totalorder %s15_s7, %s51_s8  ;;  %p57_p2 = scmp.lt.s32.totalorder %s51_s8, %s51_s8 }
   0x6   :  { %p58_p3 = por %p57_p2, %p56_p1 }
   0x8   :  { %p59_p4 = pnand %p58_p3, %p52_p0 }
   0xa   :  { %62 = shalt.err (!%p59_p4)
}
   0xb   :  { %17 = dma.hbm_to_vmem [thread:$0]  %s106_s0, 128, %s15_s7, [#allocation3]  }
   0xc   :  { %83 = dma.done.wait [#allocation3], 128  }
   0xd   :  { %84 = vsyncadd [#allocation3], 4294967168  ;;  %v21_v0 = vld [vmem:[#allocation2] sm:$0xff]  ;;  %s88_s11 = smov 3   ;;  %s89_s12 = smov [#allocation5]  }
   0xe   :  { %22 = vrot.lane.b32.xlu0 %v21_v0, %s88_s11  ;;  %s31_s13 = sshll.u32 %s89_s12, 4  ;;  %s32_s13 = int_to_ptr.vmem [resolvable:$true] %s31_s13 }
   0xf   :  { %s63_s14 = scalar_lea.vmem %s32_s13, 128  ;;  %p68_p6 = scmp.lt.s32.totalorder %s32_s13, %s32_s13 }
  0x10   :  { %p64_p5 = scmp.ne.s32.totalorder %s32_s13, %s63_s14  ;;  %p69_p7 = scmp.lt.s32.totalorder %s63_s14, %s63_s14 }
  0x12   :  { %p70_p8 = por %p69_p7, %p68_p6 }
  0x14   :  { %p71_p9 = pnand %p70_p8, %p64_p5 }
  0x80   :  { %v23_v1 = vpop.permute.xlu0 %22 }
  0x81   :  { %24 = vst [vmem:[#allocation5] sm:$0xff] %v23_v1 }
  0x82   :  { %74 = shalt.err (!%p71_p9)
}
  0x83   :  { %34 = dma.vmem_to_hbm [thread:$0]  %s32_s13, 128, %s107_s1, [#allocation4]  }
  0x84   :  { %85 = dma.done.wait [#allocation4], 128  }
  0x85   :  { %86 = vsyncadd [#allocation4], 4294967168 }
  0x86   :  { %38 = vsyncpa [#allocation3], 1 }
  0x87   :  { %39 = vsyncpa [#allocation4], 1 }

</bundles_post_ra>
